<compile_context>
chip_gen: v6e
topology: v6e:2x2x1
jax: 0.10.0
libtpu: 0.0.40
codegen_flags: <defaults>
</compile_context>

<pallas_src>
import functools

import jax
import jax.numpy as jnp
from jax.experimental import pallas as pl
from jax.experimental.pallas import tpu as pltpu


def _smelu_kernel(x_ref, o_ref, *, beta: float, inv_4beta: float):
    """Elementwise SmeLU on one VMEM tile (beta baked in at trace time).

    out = x                        , if x >= beta
        = 0                        , if x <= -beta
        = (x + beta)^2 / (4 beta)  , if |x| <= beta
    """
    x = x_ref[...]
    if beta == 0.0:
        # beta -> 0 limit of SmeLU is ReLU; avoids the 0/0 NaN of the formula.
        o_ref[...] = jnp.maximum(x, jnp.zeros_like(x))
        return
    # f32 math; select order mirrors torch.where semantics (incl. NaN -> 0).
    xf = x.astype(jnp.float32)
    out = jnp.where(xf >= beta, xf, 0.0)
    quad = (xf + beta) * (xf + beta) * inv_4beta
    out = jnp.where(jnp.abs(xf) <= beta, quad, out)
    o_ref[...] = out.astype(o_ref.dtype)


def _target_block_bytes() -> int:
    """Per-buffer block-size target: 2 MiB on v5e, 4 MiB on v6e/v7x/others."""
    try:
        kind = jax.devices()[0].device_kind.lower()
    except Exception:
        kind = ""
    if "v5 lite" in kind or "v5e" in kind or "v5litepod" in kind:
        return 2 << 20
    return 4 << 20


def smelu(x: jnp.ndarray, beta: float = 2.0, *, donate_input: bool = False) -> jnp.ndarray:
    """SmeLU activation for a tensor of any shape (same shape/dtype output)."""
    assert beta >= 0.0, f"Beta must be >= 0. beta={beta} given."
    orig_shape = x.shape
    dtype = x.dtype
    total = x.size
    if total == 0:
        return x

    itemsize = jnp.dtype(dtype).itemsize
    # Sublane packing: 8 rows for 4-byte dtypes, 16 for bf16, 32 for 1-byte.
    sub = 8 * max(1, 4 // itemsize)

    # Pick the widest lane-dense width that divides the element count.
    width = None
    for w in (1024, 512, 256, 128):
        if total % w == 0:
            width = w
            break

    x_flat = x.reshape(-1)
    pad = 0
    if width is None:
        # TODO(synk): fold the <128-element ragged tail into the kernel with a
        # masked store instead of this pad+slice extra pass over the data.
        width = 128
        rows = pl.cdiv(total, width)
        pad = rows * width - total
        x_flat = jnp.pad(x_flat, (0, pad))
    else:
        rows = total // width
    x2d = x_flat.reshape(rows, width)

    # Row-tile: ~2-4 MiB per buffer (per generation). Large vs. the ~0.35 us
    # fixed grid-step cost; in+out double-buffered stays <= 16 MiB, under the
    # explicit VMEM limit below on every generation.
    target_bytes = _target_block_bytes()
    tr = max(sub, (target_bytes // (width * itemsize)) // sub * sub)
    tr = min(tr, rows)
    # Megacore (v7x): keep >= 2 row-tiles when the tensor is big enough so
    # both TensorCores get work; no-op on single-TC chips.
    if pl.cdiv(rows, tr) < 2 and rows > sub:
        half = -(-rows // 2)                 # ceil(rows / 2)
        tr_half = -(-half // sub) * sub      # round up to a multiple of sub
        if tr_half < rows:
            tr = tr_half
    grid = (pl.cdiv(rows, tr),)

    kernel = functools.partial(
        _smelu_kernel,
        beta=float(beta),
        inv_4beta=(0.25 / float(beta)) if beta > 0.0 else 0.0,
    )

    nbytes = rows * width * itemsize
    out2d = pl.pallas_call(
        kernel,
        out_shape=jax.ShapeDtypeStruct((rows, width), dtype),
        grid=grid,
        in_specs=[pl.BlockSpec((tr, width), lambda i: (i, 0))],
        out_specs=pl.BlockSpec((tr, width), lambda i: (i, 0)),
        compiler_params=pltpu.CompilerParams(
            dimension_semantics=("parallel",),
            vmem_limit_bytes=48 << 20,
        ),
        cost_estimate=pl.CostEstimate(
            flops=8 * rows * width,
            transcendentals=0,
            bytes_accessed=2 * nbytes,
        ),
        input_output_aliases=({0: 0} if donate_input else {}),
    )(x2d)

    out = out2d.reshape(-1)
    if pad:
        out = out[:total]
    return out.reshape(orig_shape)


def _smelu_ref(x: jnp.ndarray, beta: float = 2.0) -> jnp.ndarray:
    """Pure-JAX reference mirroring the PyTorch forward."""
    out = jnp.where(x >= beta, x, jnp.zeros_like(x))
    out = jnp.where(jnp.abs(x) <= beta, (x + beta) ** 2 / (4.0 * beta), out)
    return out


if __name__ == "__main__":
    beta = 2.0
    key = jax.random.PRNGKey(0)
    k1, k2, k3 = jax.random.split(key, 3)

    # Small NCHW input spanning all three SmeLU regimes (clean, pad-free path).
    x = jax.random.normal(k1, (2, 4, 16, 16), dtype=jnp.float32) * 3.0
    y = jax.block_until_ready(smelu(x, beta=beta))
    assert y.shape == x.shape and y.dtype == x.dtype
    assert jnp.allclose(y, _smelu_ref(x, beta=beta), atol=1e-6, rtol=1e-6)

    # Ragged element count (105 elems) exercises the padded fallback path.
    x2 = jax.random.normal(k2, (3, 5, 7), dtype=jnp.float32) * 3.0
    y2 = jax.block_until_ready(smelu(x2, beta=beta))
    assert jnp.allclose(y2, _smelu_ref(x2, beta=beta), atol=1e-6, rtol=1e-6)

    # bf16 input: quadratic branch computed in f32 inside the kernel.
    x3 = (jax.random.normal(k3, (2, 4, 16, 16), dtype=jnp.float32) * 3.0).astype(jnp.bfloat16)
    y3 = jax.block_until_ready(smelu(x3, beta=beta))
    ref3 = _smelu_ref(x3.astype(jnp.float32), beta=beta).astype(jnp.bfloat16)
    assert y3.dtype == jnp.bfloat16
    assert jnp.allclose(y3.astype(jnp.float32), ref3.astype(jnp.float32),
                        atol=2e-2, rtol=2e-2)

    # beta == 0 degenerates to ReLU (mathematical limit of SmeLU).
    y4 = jax.block_until_ready(smelu(x, beta=0.0))
    assert jnp.allclose(y4, jnp.maximum(x, 0.0))

    print("KERNEL_OK")
</pallas_src>

<mosaic_0001>
module attributes {stable_mosaic.version = 11 : i64} {
  func.func @_smelu_kernel(%arg0: i32, %arg1: memref<2x1024xf32, #tpu.memory_space<vmem>>, %arg2: memref<2x1024xf32, #tpu.memory_space<vmem>>) attributes {dimension_semantics = [#tpu.dimension_semantics<parallel>], iteration_bounds = array<i64: 1>, scalar_prefetch = 0 : i64, scratch_operands = 0 : i64, tpu.core_type = #tpu.core_type<tc>, window_params = [{transform_indices = @transform_0, window_bounds = array<i64: 2, 1024>}, {transform_indices = @transform_1, window_bounds = array<i64: 2, 1024>}]} {
    %c0 = arith.constant 0 : index
    %c0_0 = arith.constant 0 : index
    %0 = vector.load %arg1[%c0, %c0_0] : memref<2x1024xf32, #tpu.memory_space<vmem>>, vector<2x1024xf32>
    %cst = arith.constant 2.000000e+00 : f32
    %1 = vector.broadcast %cst : f32 to vector<2x1024xf32>
    %2 = arith.cmpf oge, %0, %1 : vector<2x1024xf32>
    %cst_1 = arith.constant 0.000000e+00 : f32
    %3 = vector.broadcast %cst_1 : f32 to vector<2x1024xf32>
    %4 = arith.select %2, %0, %3 : vector<2x1024xi1>, vector<2x1024xf32>
    %cst_2 = arith.constant 2.000000e+00 : f32
    %5 = vector.broadcast %cst_2 : f32 to vector<2x1024xf32>
    %6 = arith.addf %0, %5 : vector<2x1024xf32>
    %cst_3 = arith.constant 2.000000e+00 : f32
    %7 = vector.broadcast %cst_3 : f32 to vector<2x1024xf32>
    %8 = arith.addf %0, %7 : vector<2x1024xf32>
    %9 = arith.mulf %6, %8 : vector<2x1024xf32>
    %cst_4 = arith.constant 1.250000e-01 : f32
    %10 = vector.broadcast %cst_4 : f32 to vector<2x1024xf32>
    %11 = arith.mulf %9, %10 : vector<2x1024xf32>
    %12 = math.absf %0 : vector<2x1024xf32>
    %cst_5 = arith.constant 2.000000e+00 : f32
    %13 = vector.broadcast %cst_5 : f32 to vector<2x1024xf32>
    %14 = arith.cmpf ole, %12, %13 : vector<2x1024xf32>
    %15 = arith.select %14, %11, %4 : vector<2x1024xi1>, vector<2x1024xf32>
    %c0_6 = arith.constant 0 : index
    %c0_7 = arith.constant 0 : index
    %16 = vector.load %arg2[%c0_6, %c0_7] : memref<2x1024xf32, #tpu.memory_space<vmem>>, vector<2x1024xf32>
    tpu.vector_store %arg2[%c0_6, %c0_7], %15 {strides = array<i32>} : memref<2x1024xf32, #tpu.memory_space<vmem>>, vector<2x1024xf32>,
    return
  }
  func.func @transform_0(%arg0: i32) -> (i32, i32) {
    %c0_i32 = arith.constant 0 : i32
    %c0_i32_0 = arith.constant 0 : i32
    return %arg0, %c0_i32 : i32, i32
  }
  func.func @transform_1(%arg0: i32) -> (i32, i32) {
    %c0_i32 = arith.constant 0 : i32
    %c0_i32_0 = arith.constant 0 : i32
    return %arg0, %c0_i32 : i32, i32
  }
}

</mosaic_0001>

<bundles_post_ra>
// kernel: tpu_custom_call.1
= control target key start
LH: loop header
LB: loop body
LE: loop exit
PB: predicated region body
PF: predicated region fallthrough
CT: control target
= control target key end

     0   :  { %6 = vsyncpa [#allocation3], 0  ;;  %s120_s0 = inlined_call_operand.hbm [shape: f32[2,1024], index: 0, kind: input, shape index: {}]   ;;  %s121_s1 = inlined_call_operand.hbm [shape: f32[2,1024], index: 1, kind: output, shape index: {}]  }
   0x1   :  { %7 = vsyncpa [#allocation4], 0  ;;  %s102_s6 = smov [#allocation2]  }
   0x2   :  { %s14_s7 = sshll.u32 %s102_s6, 4  ;;  %s15_s7 = int_to_ptr.vmem [resolvable:$true] %s14_s7 }
   0x3   :  { %s66_s8 = scalar_lea.vmem %s15_s7, 256  ;;  %p71_p1 = scmp.lt.s32.totalorder %s15_s7, %s15_s7 }
   0x4   :  { %p67_p0 = scmp.ne.s32.totalorder %s15_s7, %s66_s8  ;;  %p72_p2 = scmp.lt.s32.totalorder %s66_s8, %s66_s8 }
   0x6   :  { %p73_p3 = por %p72_p2, %p71_p1 }
   0x8   :  { %p74_p4 = pnand %p73_p3, %p67_p0 }
   0xa   :  { %77 = shalt.err (!%p74_p4)
}
   0xb   :  { %17 = dma.hbm_to_vmem [thread:$0]  %s120_s0, 256, %s15_s7, [#allocation3]  }
   0xc   :  { %98 = dma.done.wait [#allocation3], 256  }
   0xd   :  { %99 = vsyncadd [#allocation3], 4294967040  ;;  %v21_v0 = vld [vmem:[#allocation2] sm:$0xff]  ;;  %v22_v1 = vld [vmem:[#allocation2 + $0x8] sm:$0xff]  ;;  %s103_s11 = smov [#allocation5]  }
   0xe   :  { %vm23_vm0 = vcmp.ge.f32.partialorder %v21_v0, 2.0  ;;  %v27_v2 = vadd.f32 2.0, %v21_v0  ;;  %v33_v3 = vand.u32 2147483647, %v21_v0  ;;  %vm24_vm1 = vcmp.ge.f32.partialorder %v22_v1, 2.0  ;;  %s47_s12 = sshll.u32 %s103_s11, 4  ;;  %s48_s12 = int_to_ptr.vmem [resolvable:$true] %s47_s12 }
   0xf   :  { %v28_v4 = vadd.f32 2.0, %v22_v1  ;;  %v34_v5 = vand.u32 2147483647, %v22_v1  ;;  %v25_v7 = vsel %vm23_vm0, %v21_v0, 0.0  ;;  %v26_v10 = vsel %vm24_vm1, %v22_v1, 0.0  ;;  %s78_s0 = scalar_lea.vmem %s48_s12, 256  ;;  %p83_p6 = scmp.lt.s32.totalorder %s48_s12, %s48_s12 }
  0x10   :  { %v29_v6 = vmul.f32 %v27_v2, %v27_v2  ;;  %vm35_vm2 = vcmp.le.f32.partialorder %v33_v3, 2.0  ;;  %p79_p5 = scmp.ne.s32.totalorder %s48_s12, %s78_s0  ;;  %p84_p7 = scmp.lt.s32.totalorder %s78_s0, %s78_s0 }
  0x11   :  { %v30_v8 = vmul.f32 %v28_v4, %v28_v4  ;;  %vm36_vm3 = vcmp.le.f32.partialorder %v34_v5, 2.0 }
  0x12   :  { %v31_v9 = vmul.f32 0.125, %v29_v6  ;;  %p85_p8 = por %p84_p7, %p83_p6 }
  0x13   :  { %v32_v11 = vmul.f32 0.125, %v30_v8 }
  0x14   :  { %v37_v12 = vsel %vm35_vm2, %v31_v9, %v25_v7  ;;  %p86_p9 = pnand %p85_p8, %p79_p5 }
  0x15   :  { %39 = vst [vmem:[#allocation5] sm:$0xff] %v37_v12  ;;  %v38_v13 = vsel %vm36_vm3, %v32_v11, %v26_v10 }
  0x16   :  { %40 = vst [vmem:[#allocation5 + $0x8] sm:$0xff] %v38_v13 }
  0x17   :  { %89 = shalt.err (!%p86_p9)
}
  0x18   :  { %50 = dma.vmem_to_hbm [thread:$0]  %s48_s12, 256, %s121_s1, [#allocation4]  }
  0x19   :  { %100 = dma.done.wait [#allocation4], 256  }
  0x1a   :  { %101 = vsyncadd [#allocation4], 4294967040 }
  0x1b   :  { %54 = vsyncpa [#allocation3], 1 }
  0x1c   :  { %55 = vsyncpa [#allocation4], 1 }

</bundles_post_ra>
